<compile_context>
chip_gen: v7x
topology: tpu7x:2x2x1
jax: 0.10.0
libtpu: 0.0.40
codegen_flags: <defaults>
</compile_context>

<pallas_src>
import math

import jax
import jax.numpy as jnp
from jax.experimental import pallas as pl
from jax.experimental.pallas import tpu as pltpu


_VMEM_LIMIT_BYTES = 48 * 1024 * 1024  # safe on v7x (64 MiB/TC), ample on v5e/v6e


# ---------------------------------------------------------------------------
# Kernels
# ---------------------------------------------------------------------------
def _linear_kernel(x_ref, w_ref, b_ref, o_ref, acc_ref):
    """y = x @ W + b with a resident f32 accumulator over the k grid axis."""
    k = pl.program_id(2)

    @pl.when(k == 0)
    def _():
        acc_ref[...] = jnp.zeros_like(acc_ref)

    acc_ref[...] += jnp.dot(x_ref[...], w_ref[...],
                            preferred_element_type=jnp.float32)

    @pl.when(k == pl.num_programs(2) - 1)
    def _():
        o_ref[...] = (acc_ref[...] + b_ref[...]).astype(o_ref.dtype)


def _fact_noisy_kernel(x_ref, xs_ref, wmu_ref, wsig_ref, eout_ref, beff_ref,
                       o_ref, accmu_ref, accsig_ref):
    """Factorized-noise training forward via two matmuls:
         y = x @ W_mu + eps_out * ((x * eps_in) @ W_sigma) + b_eff
    No per-element noisy-weight reconstruction in-kernel.
    """
    k = pl.program_id(2)

    @pl.when(k == 0)
    def _():
        accmu_ref[...] = jnp.zeros_like(accmu_ref)
        accsig_ref[...] = jnp.zeros_like(accsig_ref)

    accmu_ref[...] += jnp.dot(x_ref[...], wmu_ref[...],
                              preferred_element_type=jnp.float32)
    accsig_ref[...] += jnp.dot(xs_ref[...], wsig_ref[...],
                               preferred_element_type=jnp.float32)

    @pl.when(k == pl.num_programs(2) - 1)
    def _():
        o_ref[...] = (accmu_ref[...] + eout_ref[...] * accsig_ref[...]
                      + beff_ref[...]).astype(o_ref.dtype)


# ---------------------------------------------------------------------------
# Tiling / padding helpers
# ---------------------------------------------------------------------------
def _cdiv(a, b):
    return -(-a // b)


def _round_up(x, m):
    return _cdiv(x, m) * m


def _pad2d(a, rows, cols):
    return jnp.pad(a, ((0, rows - a.shape[0]), (0, cols - a.shape[1])))


def _choose_tiles(M, N, K, tm, tn, tk):
    """Pick (Mp, Np, Kp), (tm, tn, tk), (nm, nn, nk).

    Pads dims to hardware minima (16 sublanes for bf16 x, 128 lanes), then
    sizes tiles so padding waste is minimal (M=300 -> Mp=304, not 512).
    Splits n when the parallel sub-grid would otherwise be a single block so
    both TensorCores on a v7x chip get work.
    """
    Mmin, Nmin, Kmin = _round_up(M, 16), _round_up(N, 128), _round_up(K, 128)
    nm = _cdiv(Mmin, tm)
    tm = _round_up(_cdiv(Mmin, nm), 16)
    nn = _cdiv(Nmin, tn)
    tn = _round_up(_cdiv(Nmin, nn), 128)
    nk = _cdiv(Kmin, tk)
    tk = _round_up(_cdiv(Kmin, nk), 128)
    # v7x megacore: guarantee >=2 blocks along a parallel axis when it costs
    # no extra padding.
    if nm * nn < 2 and Nmin >= 256 and Nmin % 256 == 0:
        nn, tn = 2, Nmin // 2
    return (nm * tm, nn * tn, nk * tk), (tm, tn, tk), (nm, nn, nk)


# ---------------------------------------------------------------------------
# Wrapper
# ---------------------------------------------------------------------------
def noisy_linear_forward(x, params, training=True, *, tm=512, tn=512, tk=1024,
                         compute_dtype=jnp.bfloat16):
    """NoisyLinear forward.  x: (batch, in_features), params from init_noisy_linear.

    training=True  : y = x @ (W_mu + W_sigma*eps_W)^T + (b_mu + b_sigma*eps_b)
    training=False : y = x @ W_mu^T + b_mu
    """
    M, K = x.shape
    N = params["weight_mu"].shape[0]
    out_dtype = x.dtype

    (Mp, Np, Kp), (tm, tn, tk), grid = _choose_tiles(M, N, K, tm, tn, tk)

    x_spec = pl.BlockSpec((tm, tk), lambda m, n, k: (m, k))
    w_spec = pl.BlockSpec((tk, tn), lambda m, n, k: (k, n))
    r_spec = pl.BlockSpec((1, tn), lambda m, n, k: (0, n))    # (1, Np) rows
    o_spec = pl.BlockSpec((tm, tn), lambda m, n, k: (m, n))

    cparams = pltpu.CompilerParams(
        dimension_semantics=("parallel", "parallel", "arbitrary"),
        vmem_limit_bytes=_VMEM_LIMIT_BYTES,
    )
    out_shape = jax.ShapeDtypeStruct((Mp, Np), out_dtype)

    def acc():
        return pltpu.VMEM((tm, tn), jnp.float32)

    # x streamed in compute_dtype (bf16 default: native MXU operand, half the
    # HBM traffic).  Zero padding is exact: padded K/N contribute 0.
    x_p = _pad2d(x, Mp, Kp).astype(compute_dtype)

    if training and "weight_eps_in" in params:
        # Factorized noise: fold eps_in into a second lane-dense x stream in
        # the wrapper; kernel does two MXU matmuls, no VPU weight math.
        xs_p = _pad2d(x * params["weight_eps_in"][None, :], Mp, Kp)
        xs_p = xs_p.astype(compute_dtype)
        w_mu = _pad2d(params["weight_mu"].T, Kp, Np).astype(compute_dtype)
        w_sig = _pad2d(params["weight_sigma"].T, Kp, Np).astype(compute_dtype)
        e_out = _pad2d(params["weight_eps_out"].reshape(1, N), 1, Np)
        b_eff = params["bias_mu"] + params["bias_sigma"] * params["bias_epsilon"]
        b_eff = _pad2d(b_eff.reshape(1, N), 1, Np)

        out = pl.pallas_call(
            _fact_noisy_kernel,
            out_shape=out_shape,
            grid_spec=pltpu.PrefetchScalarGridSpec(
                num_scalar_prefetch=0, grid=grid,
                in_specs=[x_spec, x_spec, w_spec, w_spec, r_spec, r_spec],
                out_specs=o_spec,
                scratch_shapes=[acc(), acc()]),
            compiler_params=cparams,
        )(x_p, xs_p, w_mu, w_sig, e_out, b_eff)
        return out[:M, :N]

    if training:
        # Independent noise: fold the elementwise noisy weight/bias once in
        # the wrapper (cheap HBM-bound XLA pass), reuse the plain linear kernel.
        w_eff = params["weight_mu"] + params["weight_sigma"] * params["weight_epsilon"]
        b_eff = params["bias_mu"] + params["bias_sigma"] * params["bias_epsilon"]
    else:
        w_eff = params["weight_mu"]
        b_eff = params["bias_mu"]

    w_p = _pad2d(w_eff.T, Kp, Np).astype(compute_dtype)
    b_p = _pad2d(b_eff.reshape(1, N), 1, Np)

    out = pl.pallas_call(
        _linear_kernel,
        out_shape=out_shape,
        grid_spec=pltpu.PrefetchScalarGridSpec(
            num_scalar_prefetch=0, grid=grid,
            in_specs=[x_spec, w_spec, r_spec],
            out_specs=o_spec,
            scratch_shapes=[acc()]),
        compiler_params=cparams,
    )(x_p, w_p, b_p)
    return out[:M, :N]


# ---------------------------------------------------------------------------
# Deterministic parameter / noise construction (mirrors NoisyLinear)
# ---------------------------------------------------------------------------
def _scale_noise(key, size):
    z = jax.random.normal(key, (size,), dtype=jnp.float32)
    return jnp.sign(z) * jnp.sqrt(jnp.abs(z))


def init_noisy_linear(key, in_features, out_features, factorized=True,
                      std_init=None):
    if std_init is None:
        std_init = 0.4 if factorized else 0.017
    k_wmu, k_bmu, k_ein, k_eout, k_beps = jax.random.split(key, 5)

    if factorized:
        mu_range = 1.0 / math.sqrt(in_features)
        weight_sigma = jnp.full((out_features, in_features),
                                std_init / math.sqrt(in_features), jnp.float32)
        bias_sigma = jnp.full((out_features,),
                              std_init / math.sqrt(out_features), jnp.float32)
        eps_extra = {
            "weight_eps_in": _scale_noise(k_ein, in_features),
            "weight_eps_out": _scale_noise(k_eout, out_features),
        }
        bias_epsilon = _scale_noise(k_beps, out_features)
    else:
        mu_range = math.sqrt(3.0 / in_features)
        weight_sigma = jnp.full((out_features, in_features), std_init,
                                jnp.float32)
        bias_sigma = jnp.full((out_features,), std_init, jnp.float32)
        eps_extra = {
            "weight_epsilon": jax.random.normal(
                k_ein, (out_features, in_features), dtype=jnp.float32),
        }
        bias_epsilon = jax.random.normal(k_beps, (out_features,),
                                         dtype=jnp.float32)

    weight_mu = jax.random.uniform(k_wmu, (out_features, in_features),
                                   minval=-mu_range, maxval=mu_range,
                                   dtype=jnp.float32)
    bias_mu = jax.random.uniform(k_bmu, (out_features,),
                                 minval=-mu_range, maxval=mu_range,
                                 dtype=jnp.float32)

    params = {
        "weight_mu": weight_mu,
        "weight_sigma": weight_sigma,
        "bias_mu": bias_mu,
        "bias_sigma": bias_sigma,
        "bias_epsilon": bias_epsilon,
    }
    params.update(eps_extra)
    return params


# ---------------------------------------------------------------------------
# Main
# ---------------------------------------------------------------------------
if __name__ == "__main__":
    key = jax.random.PRNGKey(0)
    k_fact, k_ind, k_x = jax.random.split(key, 3)

    batch, in_features, out_features = 12, 300, 200
    params_f = init_noisy_linear(k_fact, in_features, out_features,
                                 factorized=True)
    params_i = init_noisy_linear(k_ind, in_features, out_features,
                                 factorized=False)
    x = jax.random.normal(k_x, (batch, in_features), dtype=jnp.float32)

    # Default tiles: single k step, n split into 2 parallel blocks (v7x 2-TC).
    y_train_f = jax.block_until_ready(
        noisy_linear_forward(x, params_f, training=True))
    # Small tiles force a (1, 2, 3) grid -> exercises the k-axis accumulator
    # init/finalize path.
    y_train_f_tiled = jax.block_until_ready(
        noisy_linear_forward(x, params_f, training=True, tn=128, tk=128))
    y_train_i = jax.block_until_ready(
        noisy_linear_forward(x, params_i, training=True))
    y_eval = jax.block_until_ready(
        noisy_linear_forward(x, params_f, training=False))

    # Pure-JAX f32 references (PyTorch NoisyLinear semantics).
    w_eps_f = jnp.outer(params_f["weight_eps_out"], params_f["weight_eps_in"])
    w_eff_f = params_f["weight_mu"] + params_f["weight_sigma"] * w_eps_f
    b_eff_f = params_f["bias_mu"] + params_f["bias_sigma"] * params_f["bias_epsilon"]
    ref_train_f = x @ w_eff_f.T + b_eff_f

    w_eff_i = params_i["weight_mu"] + params_i["weight_sigma"] * params_i["weight_epsilon"]
    b_eff_i = params_i["bias_mu"] + params_i["bias_sigma"] * params_i["bias_epsilon"]
    ref_train_i = x @ w_eff_i.T + b_eff_i

    ref_eval = x @ params_f["weight_mu"].T + params_f["bias_mu"]

    # bf16 weight/x streams with f32 accumulation -> tolerance sized for bf16.
    tol = dict(atol=2e-2, rtol=2e-2)
    assert y_train_f.shape == (batch, out_features)
    assert y_train_i.shape == (batch, out_features)
    assert y_eval.shape == (batch, out_features)
    assert jnp.allclose(y_train_f, ref_train_f, **tol)
    assert jnp.allclose(y_train_f_tiled, ref_train_f, **tol)
    assert jnp.allclose(y_train_f, y_train_f_tiled, atol=1e-3, rtol=1e-3)
    assert jnp.allclose(y_train_i, ref_train_i, **tol)
    assert jnp.allclose(y_eval, ref_eval, **tol)

    print("KERNEL_OK")
</pallas_src>

<mosaic_0001>
module attributes {stable_mosaic.version = 11 : i64} {
  func.func @_fact_noisy_kernel(%arg0: i32, %arg1: i32, %arg2: i32, %arg3: memref<16x384xbf16, #tpu.memory_space<vmem>>, %arg4: memref<16x384xbf16, #tpu.memory_space<vmem>>, %arg5: memref<384x128xbf16, #tpu.memory_space<vmem>>, %arg6: memref<384x128xbf16, #tpu.memory_space<vmem>>, %arg7: memref<1x128xf32, #tpu.memory_space<vmem>>, %arg8: memref<1x128xf32, #tpu.memory_space<vmem>>, %arg9: memref<16x128xf32, #tpu.memory_space<vmem>>, %arg10: memref<16x128xf32, #tpu.memory_space<vmem>>, %arg11: memref<16x128xf32, #tpu.memory_space<vmem>>) attributes {dimension_semantics = [#tpu.dimension_semantics<parallel>, #tpu.dimension_semantics<parallel>, #tpu.dimension_semantics<arbitrary>], iteration_bounds = array<i64: 1, 2, 1>, scalar_prefetch = 0 : i64, scratch_operands = 2 : i64, tpu.core_type = #tpu.core_type<tc>, window_params = [{transform_indices = @transform_0, window_bounds = array<i64: 16, 384>}, {transform_indices = @transform_1, window_bounds = array<i64: 16, 384>}, {transform_indices = @transform_2, window_bounds = array<i64: 384, 128>}, {transform_indices = @transform_3, window_bounds = array<i64: 384, 128>}, {transform_indices = @transform_4, window_bounds = array<i64: 1, 128>}, {transform_indices = @transform_5, window_bounds = array<i64: 1, 128>}, {transform_indices = @transform_6, window_bounds = array<i64: 16, 128>}]} {
    %c0_i32 = arith.constant 0 : i32
    %0 = arith.cmpi eq, %arg2, %c0_i32 : i32
    %1 = arith.extui %0 : i1 to i32
    %c0_i32_0 = arith.constant 0 : i32
    %2 = arith.cmpi ne, %1, %c0_i32_0 : i32
    scf.if %2 {
      %cst_19 = arith.constant 0.000000e+00 : f32
      %18 = vector.broadcast %cst_19 : f32 to vector<16x128xf32>
      %c0_20 = arith.constant 0 : index
      %c0_21 = arith.constant 0 : index
      %19 = vector.load %arg10[%c0_20, %c0_21] : memref<16x128xf32, #tpu.memory_space<vmem>>, vector<16x128xf32>
      tpu.vector_store %arg10[%c0_20, %c0_21], %18 {strides = array<i32>} : memref<16x128xf32, #tpu.memory_space<vmem>>, vector<16x128xf32>,
      %cst_22 = arith.constant 0.000000e+00 : f32
      %20 = vector.broadcast %cst_22 : f32 to vector<16x128xf32>
      %c0_23 = arith.constant 0 : index
      %c0_24 = arith.constant 0 : index
      %21 = vector.load %arg11[%c0_23, %c0_24] : memref<16x128xf32, #tpu.memory_space<vmem>>, vector<16x128xf32>
      tpu.vector_store %arg11[%c0_23, %c0_24], %20 {strides = array<i32>} : memref<16x128xf32, #tpu.memory_space<vmem>>, vector<16x128xf32>,
    } else {
    }
    %c0 = arith.constant 0 : index
    %c0_1 = arith.constant 0 : index
    %3 = vector.load %arg10[%c0, %c0_1] : memref<16x128xf32, #tpu.memory_space<vmem>>, vector<16x128xf32>
    %c0_2 = arith.constant 0 : index
    %c0_3 = arith.constant 0 : index
    %4 = vector.load %arg3[%c0_2, %c0_3] : memref<16x384xbf16, #tpu.memory_space<vmem>>, vector<16x384xbf16>
    %c0_4 = arith.constant 0 : index
    %c0_5 = arith.constant 0 : index
    %5 = vector.load %arg5[%c0_4, %c0_5] : memref<384x128xbf16, #tpu.memory_space<vmem>>, vector<384x128xbf16>
    %cst = arith.constant dense<0.000000e+00> : vector<16x128xf32>
    %6 = tpu.matmul %4, %5, %cst {dimension_numbers = #tpu.dot_dimension_numbers<[1], [0], [0], [1], [0, 0, 1, 1], [], []>} : vector<16x384xbf16>, vector<384x128xbf16>, vector<16x128xf32> -> vector<16x128xf32>
    %7 = arith.addf %3, %6 : vector<16x128xf32>
    %c0_6 = arith.constant 0 : index
    %c0_7 = arith.constant 0 : index
    %8 = vector.load %arg10[%c0_6, %c0_7] : memref<16x128xf32, #tpu.memory_space<vmem>>, vector<16x128xf32>
    tpu.vector_store %arg10[%c0_6, %c0_7], %7 {strides = array<i32>} : memref<16x128xf32, #tpu.memory_space<vmem>>, vector<16x128xf32>,
    %c0_8 = arith.constant 0 : index
    %c0_9 = arith.constant 0 : index
    %9 = vector.load %arg11[%c0_8, %c0_9] : memref<16x128xf32, #tpu.memory_space<vmem>>, vector<16x128xf32>
    %c0_10 = arith.constant 0 : index
    %c0_11 = arith.constant 0 : index
    %10 = vector.load %arg4[%c0_10, %c0_11] : memref<16x384xbf16, #tpu.memory_space<vmem>>, vector<16x384xbf16>
    %c0_12 = arith.constant 0 : index
    %c0_13 = arith.constant 0 : index
    %11 = vector.load %arg6[%c0_12, %c0_13] : memref<384x128xbf16, #tpu.memory_space<vmem>>, vector<384x128xbf16>
    %cst_14 = arith.constant dense<0.000000e+00> : vector<16x128xf32>
    %12 = tpu.matmul %10, %11, %cst_14 {dimension_numbers = #tpu.dot_dimension_numbers<[1], [0], [0], [1], [0, 0, 1, 1], [], []>} : vector<16x384xbf16>, vector<384x128xbf16>, vector<16x128xf32> -> vector<16x128xf32>
    %13 = arith.addf %9, %12 : vector<16x128xf32>
    %c0_15 = arith.constant 0 : index
    %c0_16 = arith.constant 0 : index
    %14 = vector.load %arg11[%c0_15, %c0_16] : memref<16x128xf32, #tpu.memory_space<vmem>>, vector<16x128xf32>
    tpu.vector_store %arg11[%c0_15, %c0_16], %13 {strides = array<i32>} : memref<16x128xf32, #tpu.memory_space<vmem>>, vector<16x128xf32>,
    %c0_i32_17 = arith.constant 0 : i32
    %15 = arith.cmpi eq, %arg2, %c0_i32_17 : i32
    %16 = arith.extui %15 : i1 to i32
    %c0_i32_18 = arith.constant 0 : i32
    %17 = arith.cmpi ne, %16, %c0_i32_18 : i32
    scf.if %17 {
      %c0_19 = arith.constant 0 : index
      %c0_20 = arith.constant 0 : index
      %18 = vector.load %arg10[%c0_19, %c0_20] : memref<16x128xf32, #tpu.memory_space<vmem>>, vector<16x128xf32>
      %c0_21 = arith.constant 0 : index
      %c0_22 = arith.constant 0 : index
      %19 = vector.load %arg7[%c0_21, %c0_22] : memref<1x128xf32, #tpu.memory_space<vmem>>, vector<1x128xf32>
      %c0_23 = arith.constant 0 : index
      %c0_24 = arith.constant 0 : index
      %20 = vector.load %arg11[%c0_23, %c0_24] : memref<16x128xf32, #tpu.memory_space<vmem>>, vector<16x128xf32>
      %21 = vector.broadcast %19 : vector<1x128xf32> to vector<16x128xf32>
      %22 = arith.mulf %21, %20 : vector<16x128xf32>
      %23 = arith.addf %18, %22 : vector<16x128xf32>
      %c0_25 = arith.constant 0 : index
      %c0_26 = arith.constant 0 : index
      %24 = vector.load %arg8[%c0_25, %c0_26] : memref<1x128xf32, #tpu.memory_space<vmem>>, vector<1x128xf32>
      %25 = vector.broadcast %24 : vector<1x128xf32> to vector<16x128xf32>
      %26 = arith.addf %23, %25 : vector<16x128xf32>
      %c0_27 = arith.constant 0 : index
      %c0_28 = arith.constant 0 : index
      %27 = vector.load %arg9[%c0_27, %c0_28] : memref<16x128xf32, #tpu.memory_space<vmem>>, vector<16x128xf32>
      tpu.vector_store %arg9[%c0_27, %c0_28], %26 {strides = array<i32>} : memref<16x128xf32, #tpu.memory_space<vmem>>, vector<16x128xf32>,
    } else {
    }
    return
  }
  func.func @transform_0(%arg0: i32, %arg1: i32, %arg2: i32) -> (i32, i32) {
    %c0_i32 = arith.constant 0 : i32
    return %arg0, %arg2 : i32, i32
  }
  func.func @transform_1(%arg0: i32, %arg1: i32, %arg2: i32) -> (i32, i32) {
    %c0_i32 = arith.constant 0 : i32
    return %arg0, %arg2 : i32, i32
  }
  func.func @transform_2(%arg0: i32, %arg1: i32, %arg2: i32) -> (i32, i32) {
    %c0_i32 = arith.constant 0 : i32
    return %arg2, %arg1 : i32, i32
  }
  func.func @transform_3(%arg0: i32, %arg1: i32, %arg2: i32) -> (i32, i32) {
    %c0_i32 = arith.constant 0 : i32
    return %arg2, %arg1 : i32, i32
  }
  func.func @transform_4(%arg0: i32, %arg1: i32, %arg2: i32) -> (i32, i32) {
    %c0_i32 = arith.constant 0 : i32
    %c0_i32_0 = arith.constant 0 : i32
    return %c0_i32, %arg1 : i32, i32
  }
  func.func @transform_5(%arg0: i32, %arg1: i32, %arg2: i32) -> (i32, i32) {
    %c0_i32 = arith.constant 0 : i32
    %c0_i32_0 = arith.constant 0 : i32
    return %c0_i32, %arg1 : i32, i32
  }
  func.func @transform_6(%arg0: i32, %arg1: i32, %arg2: i32) -> (i32, i32) {
    %c0_i32 = arith.constant 0 : i32
    return %arg0, %arg1 : i32, i32
  }
}

</mosaic_0001>

<bundles_post_ra>
// kernel: tpu_custom_call.1
= control target key start
LH: loop header
LB: loop body
LE: loop exit
PB: predicated region body
PF: predicated region fallthrough
CT: control target
= control target key end

     0   :  { %s2219_s0 = inlined_call_operand.hbm [shape: bf16[16,384], index: 0, kind: input, shape index: {}]   ;;  %s2220_s1 = inlined_call_operand.hbm [shape: bf16[16,384], index: 1, kind: input, shape index: {}]   ;;  %s2221_s2 = inlined_call_operand.hbm [shape: bf16[384,256], index: 2, kind: input, shape index: {}]   ;;  %s2222_s3 = inlined_call_operand.hbm [shape: bf16[384,256], index: 3, kind: input, shape index: {}]   ;;  %s2223_s4 = inlined_call_operand.vmem [shape: f32[1,256], index: 4, kind: input, shape index: {}]   ;;  %s2224_s5 = inlined_call_operand.vmem [shape: f32[1,256], index: 5, kind: input, shape index: {}]   ;;  %s2225_s6 = inlined_call_operand.hbm [shape: f32[16,256], index: 6, kind: output, shape index: {}]  }
   0x1   :  { %2244 = sst [smem:[#allocation22_spill]] %s2219_s0 }
   0x2   :  { %2245 = sst [smem:[#allocation23_spill]] %s2221_s2 }
   0x3   :  { %2246 = sst [smem:[#allocation24_spill]] %s2225_s6 }
   0x4   :  { %11 = vsyncpa [#allocation5], 0 }
   0x5   :  { %12 = vsyncpa [#allocation8], 0 }
   0x6   :  { %13 = vsyncpa [#allocation6], 0 }
   0x7   :  { %15 = vsyncpa [#allocation6 + $0x1], 0  ;;  %s1824_s21 = smov 0   ;;  %s1826_s22 = smov 0  }
   0x8   :  { %s1828_s23 = smov 0   ;;  %s1830_s24 = smov 0  }
   0x9   :  { %s1832_s25 = smov 0   ;;  %s1834_s26 = smov 0  }
   0xa LB: > { %2247 = sst [smem:[#allocation16_spill]] %s1752_s21  ;;  %s1855_s27 = sadd.s32 4294967295, %s1772_s26   ;;  %s1772_s26 = sphi %s1834_s26, %s21_s26   ;;  %s1768_s25 = sphi %s1832_s25, %s2291_s25   ;;  %s1764_s24 = sphi %s1830_s24, %s2290_s24   ;;  %s1760_s23 = sphi %s1828_s23, %s2286_s23   ;;  %s1756_s22 = sphi %s1826_s22, %s2289_s22   ;;  %s1752_s21 = sphi %s1824_s21, %s2288_s21  }
   0xb   : > { %2248 = sst [smem:[#allocation17_spill]] %s1760_s23  ;;  %s1236_s28 = sadd.s32 4294967294, %s1772_s26  }
   0xc   : > { %2249 = sst [smem:[#allocation18_spill]] %s1772_s26  ;;  %p112_p0 = scmp.ne.s32.totalorder %s1760_s23, %s1756_s22 }
   0xd   : > { %p113_p1 = scmp.eq.s32.totalorder %s1772_s26, 0  ;;  %p118_p2 = scmp.ne.s32.totalorder %s1756_s22, %s1752_s21 }
   0xe   : > { %p2226_p3 = scmp.eq.s32.totalorder %s1855_s27, 0  ;;  %p224_p4 = scmp.eq.s32.totalorder %s1855_s27, 1 }
   0xf   : > { %p1866_p5 = por %p113_p1, %p112_p0  ;;  %p230_p6 = scmp.eq.s32.totalorder %s1236_s28, 1 }
  0x10   : > { %p1872_p7 = por %p2226_p3, %p118_p2  ;;  %p1876_p8 = por %p224_p4, %p112_p0 }
  0x11   : > { %p1880_p9 = por %p230_p6, %p118_p2  ;;  %p1237_p10 = scmp.ge.s32.totalorder %s1772_s26, 1 }
  0x12   : > { %s2251_s7 = scalar_select %p1872_p7, 1, 0 }
  0x13   : > { %s2252_s8 = scalar_select %p1876_p8, 1, 0 }
  0x14   : > { %s2253_s9 = scalar_select %p1880_p9, 1, 0 }
  0x15   : > { %p237_p11 = scmp.lt.s32.totalorder %s1772_s26, 3  ;;  %s1774_s11 = smov [#allocation4]  }
  0x16   : > { %2254 = sst [smem:[#allocation19_spill]] %s2253_s9  ;;  %s255_s12 = sshll.u32 %s1774_s11, 4  ;;  %s1890_s12 = int_to_ptr.vmem [resolvable:$true] %s255_s12 }
  0x17   : > { %p1886_p12 = pnand %p1237_p10, %p237_p11  ;;  %p1446_p1 = scmp.lt.s32.totalorder %s1772_s26, 2 }
  0x18   : > { %s36_s15 = sadd.s32 1, %s1768_s25  ;;  %s2259_s0 = sld [smem:[#allocation22_spill]] }
  0x19   : > { %s2255_s10 = scalar_select %p1886_p12, 1, 0 }
  0x1a   : > { %p1426_p13 = pneg %p1886_p12  ;;  %p1904_p4 = pnand %p1446_p1, %p1866_p5 }
  0x1b   : > { %p1909_p6 = scmp.ge.s32.totalorder %s36_s15, 2 }
  0x1c   : > { %p1898_p2 = pnand %p1426_p13, %p2226_p3 }
  0x1d   : > { %s2257_s14 = scalar_select %p1904_p4, 1, 0 }
  0x1e   : > { %s1566_s19 = scalar_lea.hbm %s2259_s0, 384  ;;  %p2236_p11 = pneg %p1898_p2 }
  0x1f   : > { %p1567_p10 = scmp.ne.s32.totalorder %s2259_s0, %s1566_s19  ;;  %p1573_p1 = scmp.lt.u32.totalorder %s1566_s19, %s2259_s0 }
  0x21   : > { %p1569_p5 = pnand %p2236_p11, %p1567_p10 }
  0x23   : > { %p1570_p13 = pneg %p1569_p5 }
  0x25   : > { %p1575_p0 = pnand %p1573_p1, %p1570_p13 }
  0x27   : > { %1578 = shalt.err (!%p1575_p0)
}
  0x28   : > { %s1579_s17 = scalar_lea.vmem %s1890_s12, 384  ;;  %p1587_p7 = scmp.lt.s32.totalorder %s1890_s12, %s1890_s12 }
  0x29   : > { %p1580_p3 = scmp.ne.s32.totalorder %s1890_s12, %s1579_s17  ;;  %p1588_p10 = scmp.lt.s32.totalorder %s1579_s17, %s1579_s17 }
  0x2b   : > { %p1582_p9 = pnand %p1580_p3, %p2236_p11  ;;  %p1589_p5 = por %p1588_p10, %p1587_p7 }
  0x2d   : > { %p1583_p8 = pneg %p1582_p9 }
  0x2f   : > { %p1590_p12 = pnand %p1589_p5, %p1583_p8 }
  0x31   : > { %1593 = shalt.err (!%p1590_p12)
}
  0x32   : > { %s2233_s18 = smov 192   ;;  %s2234_s19 = smov 12  }
  0x33   : > { %1429 = dma.hbm_to_vmem [thread:$0]  (!%p1898_p2), %s2259_s0, 384, %s1890_s12, [#allocation5], %s2233_s18, %s2233_s18, %s2234_s19  }
  0x34   : > { %s288_s30 = sand.u32 1, %s1772_s26   ;;  %s2293_s15 = smov (%p1909_p6, %s36_s15), 0 }
  0x35   : > { %2260 = sst [smem:[#allocation20_spill]] %s2293_s15  ;;  %s290_s11 = sand.u32 1, %s1760_s23  }
  0x36   : > { %s101_s17 = ssub.s32 %s1768_s25, %s2293_s15  ;;  %s1951_s29 = smul.u32 192, %s290_s11 }
  0x37   : > { %p103_p3 = scmp.eq.s32.totalorder %s101_s17, 0  ;;  %s2235_s9 = sshll.u32 %s1768_s25, 6 }
  0x38   : > { %s2261_s2 = sld [smem:[#allocation23_spill]]  ;;  %s2262_s12 = sadd.s32 1, %s1760_s23 }
  0x39   : > { %s1964_s16 = scalar_select %p103_p3, %s1760_s23, %s2262_s12  }
  0x3a   : > { %s292_s28 = scalar_lea.vmem [#allocation9], %s1951_s29  ;;  %s1969_s11 = scalar_lea.sflag [#allocation5], %s288_s30 }
  0x3b   : > { %2263 = sst [smem:[#allocation21_spill]] %s1964_s16  ;;  %s301_s18 = sshll.u32 %s292_s28, 4  ;;  %s1967_s18 = int_to_ptr.vmem [resolvable:$true] %s301_s18 }
  0x3c   : > { %p2241_p8 = pneg %p1904_p4 }
  0x3e   : > { %s1959_s20 = scalar_lea.hbm %s2261_s2, %s2235_s9  ;;  %s1599_s19 = scalar_lea.hbm %s2261_s2, 6144 }
  0x3f   : > { %s1594_s17 = scalar_lea.hbm %s1959_s20, 3072  ;;  %p1600_p0 = scmp.lt.u32.totalorder %s1959_s20, %s2261_s2 }
  0x40   : > { %p1595_p7 = scmp.ne.s32.totalorder %s1959_s20, %s1594_s17  ;;  %p1601_p6 = scmp.lt.u32.totalorder %s1599_s19, %s1594_s17 }
  0x41   : > { %p1603_p1 = scmp.lt.u32.totalorder %s1594_s17, %s1959_s20 }
  0x42   : > { %p1597_p9 = pnand %p2241_p8, %p1595_p7  ;;  %p1602_p13 = por %p1601_p6, %p1600_p0 }
  0x44   : > { %p1598_p12 = pneg %p1597_p9  ;;  %p1604_p10 = por %p1603_p1, %p1602_p13 }
  0x46   : > { %p1605_p5 = pnand %p1604_p10, %p1598_p12 }
  0x48   : > { %1608 = shalt.err (!%p1605_p5)
}
  0x49   : > { %s1609_s30 = scalar_lea.vmem %s1967_s18, 3072  ;;  %s1777_s28 = smov [#allocation9]  }
  0x4a   : > { %p1610_p3 = scmp.ne.s32.totalorder %s1967_s18, %s1609_s30  ;;  %s1614_s6 = sshll.u32 %s1777_s28, 4  ;;  %s1615_s6 = int_to_ptr.vmem [resolvable:$false] %s1614_s6 }
  0x4b   : > { %s1616_s9 = scalar_lea.vmem %s1615_s6, 6144  ;;  %p1617_p11 = scmp.lt.s32.totalorder %s1967_s18, %s1615_s6 }
  0x4c   : > { %p1612_p7 = pnand %p1610_p3, %p2241_p8  ;;  %p1618_p0 = scmp.lt.s32.totalorder %s1616_s9, %s1609_s30 }
  0x4e   : > { %p1613_p9 = pneg %p1612_p7  ;;  %p1619_p6 = por %p1618_p0, %p1617_p11 }
  0x50   : > { %p1620_p13 = pnand %p1619_p6, %p1613_p9 }
  0x52   : > { %1623 = shalt.err (!%p1620_p13)
}
  0x53   : > { %s1778_s19 = smov 128   ;;  %s1779_s17 = smov 64  }
  0x54   : > { %s1780_s21 = smov 4   ;;  %s1781_s12 = smov [#allocation7]  }
  0x55   : > { %1436 = dma.hbm_to_vmem [thread:$0]  (!%p1904_p4), %s1959_s20, 3072, %s1967_s18, %s1969_s11, %s1778_s19, %s1779_s17, %s1780_s21  }
  0x56   : > { %s274_s28 = sshll.u32 %s1781_s12, 4  ;;  %s2264_s30 = sshll.u32 %s1768_s25, 6  ;;  %s275_s28 = int_to_ptr.vmem [resolvable:$true] %s274_s28 }
  0x57   : > { %s2005_s0 = scalar_lea.hbm %s2222_s3, %s2264_s30  ;;  %s1624_s16 = scalar_lea.hbm %s2220_s1, 384 }
  0x58   : > { %p1625_p11 = scmp.ne.s32.totalorder %s2220_s1, %s1624_s16  ;;  %p2265_p12 = pneg %p1898_p2 }
  0x59   : > { %p1631_p5 = scmp.lt.u32.totalorder %s1624_s16, %s2220_s1 }
  0x5a   : > { %p1627_p1 = pnand %p1625_p11, %p2265_p12 }
  0x5c   : > { %p1628_p10 = pneg %p1627_p1 }
  0x5e   : > { %p1633_p3 = pnand %p1631_p5, %p1628_p10 }
  0x60   : > { %1636 = shalt.err (!%p1633_p3)
}
  0x61   : > { %s1637_s12 = scalar_lea.vmem %s275_s28, 384  ;;  %p2266_p9 = pmov %p2265_p12 }
  0x62   : > { %p1638_p7 = scmp.ne.s32.totalorder %s275_s28, %s1637_s12  ;;  %p1645_p13 = scmp.lt.s32.totalorder %s275_s28, %s275_s28 }
  0x63   : > { %p1646_p8 = scmp.lt.s32.totalorder %s1637_s12, %s1637_s12 }
  0x64   : > { %p1640_p0 = pnand %p1638_p7, %p2266_p9 }
  0x65   : > { %p1647_p4 = por %p1646_p8, %p1645_p13 }
  0x66   : > { %p1641_p6 = pneg %p1640_p0 }
  0x68   : > { %p1648_p11 = pnand %p1647_p4, %p1641_p6 }
  0x6a   : > { %1651 = shalt.err (!%p1648_p11)
}
  0x6b   : > { %s2267_s2 = smov 12   ;;  %s2268_s23 = smov 192  }
  0x6c   : > { %1432 = dma.hbm_to_vmem [thread:$0]  (!%p1898_p2), %s2220_s1, 384, %s275_s28, [#allocation8], %s2268_s23, %s2268_s23, %s2267_s2  }
  0x6d   : > { %s315_s16 = scalar_lea.vmem [#allocation10], %s1951_s29  ;;  %s1652_s6 = scalar_lea.hbm %s2005_s0, 3072 }
  0x6e   : > { %s324_s30 = sshll.u32 %s315_s16, 4  ;;  %p1653_p4 = scmp.ne.s32.totalorder %s2005_s0, %s1652_s6  ;;  %s2031_s30 = int_to_ptr.vmem [resolvable:$true] %s324_s30 }
  0x6f   : > { %p2269_p8 = scmp.ne.s32.totalorder %s2257_s14, 0  ;;  %s1657_s18 = scalar_lea.hbm %s2222_s3, 6144 }
  0x70   : > { %p1658_p5 = scmp.lt.u32.totalorder %s2005_s0, %s2222_s3  ;;  %p1659_p3 = scmp.lt.u32.totalorder %s1657_s18, %s1652_s6 }
  0x71   : > { %p2270_p12 = pneg %p2269_p8  ;;  %p1661_p7 = scmp.lt.u32.totalorder %s1652_s6, %s2005_s0 }
  0x72   : > { %p1660_p2 = por %p1659_p3, %p1658_p5 }
  0x73   : > { %p1655_p1 = pnand %p1653_p4, %p2270_p12 }
  0x74   : > { %p1662_p9 = por %p1661_p7, %p1660_p2 }
  0x75   : > { %p1656_p10 = pneg %p1655_p1 }
  0x77   : > { %p1663_p0 = pnand %p1662_p9, %p1656_p10 }
  0x79   : > { %1666 = shalt.err (!%p1663_p0)
}
  0x7a   : > { %s1667_s29 = scalar_lea.vmem %s2031_s30, 3072  ;;  %p2271_p13 = pmov %p2270_p12 }
  0x7b   : > { %p1668_p6 = scmp.ne.s32.totalorder %s2031_s30, %s1667_s29  ;;  %s1782_s28 = smov [#allocation10]  }
  0x7c   : > { %s1672_s2 = sshll.u32 %s1782_s28, 4  ;;  %s1673_s2 = int_to_ptr.vmem [resolvable:$false] %s1672_s2 }
  0x7d   : > { %p1670_p11 = pnand %p1668_p6, %p2271_p13  ;;  %s1674_s23 = scalar_lea.vmem %s1673_s2, 6144 }
  0x7e   : > { %p1675_p12 = scmp.lt.s32.totalorder %s2031_s30, %s1673_s2  ;;  %p1676_p1 = scmp.lt.s32.totalorder %s1674_s23, %s1667_s29 }
  0x7f   : > { %p1671_p4 = pneg %p1670_p11 }
  0x80   : > { %p1677_p5 = por %p1676_p1, %p1675_p12 }
  0x82   : > { %p1678_p3 = pnand %p1677_p5, %p1671_p4 }
  0x84   : > { %1681 = shalt.err (!%p1678_p3)
}
  0x85   : > { %1439 = dma.hbm_to_vmem [thread:$0]  (!%p2269_p8), %s2005_s0, 3072, %s2031_s30, %s1969_s11, %s1778_s19, %s1779_s17, %s1780_s21  }
  0x86   : > { %p2272_p10 = scmp.ne.s32.totalorder %s2255_s10, 0 }
  0x87   : > { %p2273_p2 = scmp.eq.s32.totalorder (!%p2272_p10), %s1855_s27, 0 }
  0x88   : > { %348 = sbr.rel (%p2272_p10) target bundleno = 459 (0x1cb), region = 44 }
  0x8f   : > { %1735 = dma.done.wait (%p2273_p2), [#allocation5], 384   ;;  %p2274_p7 = pmov %p2273_p2 }
  0x90   : > { %p2275_p9 = pmov %p2273_p2 }
  0x91   : > { %1737 = vsyncadd (%p2274_p7), [#allocation5], 4294966912 }
  0x92   : > { %1739 = dma.done.wait (%p2275_p9), [#allocation8], 384   ;;  %p2276_p0 = pmov %p2273_p2 }
  0x93   : > { %s358_s14 = sand.u32 1, %s1855_s27   ;;  %s2072_s0 = sand.u32 1, %s1756_s22  }
  0x94   : > { %1741 = vsyncadd (%p2276_p0), [#allocation8], 4294966912  ;;  %s1411_s10 = smul.u32 192, %s2072_s0  ;;  %s359_s11 = scalar_lea.sflag [#allocation5], %s358_s14 }
  0x95   : > { %p2277_p8 = scmp.ne.s32.totalorder %s2251_s7, 0 }
  0x96   : > { %s2077_s19 = scalar_lea.vmem [#allocation9], %s1411_s10 }
  0x97   : > { %1743 = dma.done.wait (%p2277_p8), %s359_s11, 6144  }
  0x98   : > { %1745 = vsyncadd (%p2277_p8), %s359_s11, 4294961152  ;;  %v1783_v0 = vmov 0.0   ;;  %vm1784_vm0 = vmmov 0   ;;  %v1510_v1 = vld [vmem:[%s2077_s19 + $0x40] sm:$0xff]   ;;  %v1513_v4 = vld [vmem:[%s2077_s19 + $0x48] sm:$0xff]   ;;  %s2116_s27 = scalar_lea.vmem [#allocation10], %s1411_s10 }
  0x99   : > { %1369 = vmatprep.subr.bf16.mxu1 %v1783_v0  ;;  %1385 = vmatprep.mubr.msk.bf16.mxu1 %vm1784_vm0, %v1783_v0  ;;  %v1511_v2 = vld [vmem:[%s2077_s19] sm:$0xff]   ;;  %v1514_v5 = vld [vmem:[%s2077_s19 + $0x8] sm:$0xff]   ;;  %v1516_v7 = vld [vmem:[%s2077_s19 + $0x50] sm:$0xff]   ;;  %p417_p6 = scmp.lt.s32.totalorder %s1764_s24, 1  ;;  %s1246_s15 = sshll.u32 %s2072_s0, 4 }
  0x9a   : > { %1307 = vmatprep.subr.bf16.mxu0 %v1510_v1  ;;  %v1512_v3 = vld [vmem:[%s2077_s19 + $0x80] sm:$0xff]   ;;  %v1515_v6 = vld [vmem:[%s2077_s19 + $0x88] sm:$0xff]   ;;  %v1517_v8 = vld [vmem:[%s2077_s19 + $0x10] sm:$0xff]   ;;  %s410_s13 = scalar_lea.vmem [#allocation11], %s1246_s15  ;;  %s1304_s18 = sshll.u32 %s1764_s24, 7 }
  0x9b   : > { %1308 = vmatpush3.bf16.msra.mxu0 %v1511_v2  ;;  %1370 = vmatpush3.bf16.msra.mxu1 %v1512_v3  ;;  %v1518_v9 = vld [vmem:[%s2077_s19 + $0x90] sm:$0xff]   ;;  %v1519_v10 = vld [vmem:[%s2077_s19 + $0x58] sm:$0xff]   ;;  %v1522_v13 = vld [vmem:[%s2077_s19 + $0x60] sm:$0xff]   ;;  %s418_s7 = scalar_select %p417_p6, %s1764_s24, 1 }
  0x9c   : > { %1309 = vmatprep.subr.bf16.mxu0 %v1513_v4  ;;  %1371 = vmatprep.subr.bf16.mxu1 %v1783_v0  ;;  %v1520_v11 = vld [vmem:[%s2077_s19 + $0x18] sm:$0xff]   ;;  %v1523_v14 = vld [vmem:[%s2077_s19 + $0x20] sm:$0xff]   ;;  %v1525_v16 = vld [vmem:[%s2077_s19 + $0x68] sm:$0xff]   ;;  %s1078_s9 = sshll.u32 %s410_s13, 4  ;;  %s2278_s29 = sld [smem:[#allocation24_spill]]  ;;  %s2165_s9 = int_to_ptr.vmem [resolvable:$true] %s1078_s9 }
  0x9d   : > { %v1521_v12 = vld [vmem:[%s2077_s19 + $0x98] sm:$0xff]   ;;  %v1524_v15 = vld [vmem:[%s2077_s19 + $0xa0] sm:$0xff]   ;;  %v1526_v17 = vld [vmem:[%s2077_s19 + $0x28] sm:$0xff]   ;;  %s419_s26 = scalar_lea.vmem %s2223_s4, %s418_s7  ;;  %s422_s6 = scalar_lea.vmem %s2224_s5, %s418_s7 }
  0x9e   : > { %v1527_v18 = vld [vmem:[%s2077_s19 + $0xa8] sm:$0xff]   ;;  %v1528_v19 = vld [vmem:[%s2077_s19 + $0x70] sm:$0xff]   ;;  %v1531_v22 = vld [vmem:[%s2077_s19 + $0x78] sm:$0xff]   ;;  %s1063_s2 = scalar_lea.sflag [#allocation6], %s2072_s0  ;;  %s1682_s23 = scalar_lea.vmem %s2165_s9, 256 }
  0x9f   : > { %1310 = vmatpush3.bf16.msra.mxu0 %v1514_v5  ;;  %1372 = vmatpush3.bf16.msra.mxu1 %v1515_v6  ;;  %v1529_v20 = vld [vmem:[%s2077_s19 + $0x30] sm:$0xff]   ;;  %v1532_v24 = vld [vmem:[%s2077_s19 + $0x38] sm:$0xff]   ;;  %v1537_v27 = vld [vmem:[%s2116_s27 + $0x40] sm:$0xff]   ;;  %p1683_p13 = scmp.ne.s32.totalorder %s2165_s9, %s1682_s23  ;;  %p2279_p11 = scmp.ne.s32.totalorder %s2252_s8, 0 }
  0xa0   : > { %1311 = vmatprep.subr.bf16.mxu0 %v1516_v7  ;;  %1373 = vmatprep.subr.bf16.mxu1 %v1783_v0  ;;  %v1530_v21 = vld [vmem:[%s2077_s19 + $0xb0] sm:$0xff]   ;;  %v1533_v25 = vld [vmem:[%s2077_s19 + $0xb8] sm:$0xff]   ;;  %v1539_v29 = vld [vmem:[%s2116_s27] sm:$0xff]   ;;  %s1785_s24 = smov [#allocation11]  }
  0xa1   : > { %v1536_v23 = vld [vmem:[#allocation4 + $0x4] ss:$12 sps:$4 sm:$0xff]   ;;  %v1534_v26 = vld [vmem:[#allocation4] ss:$12 sps:$4 sm:$0xff]   ;;  %v1538_v28 = vld [vmem:[#allocation4 + $0x8] ss:$12 sps:$4 sm:$0xff]   ;;  %p1684_p4 = pnand %p1683_p13, %p2279_p11 }
  0xa2   : > { %679 = vmatprep.mubr.bf16.mxu0 %v1536_v23  ;;  %v1540_v30 = vld [vmem:[%s2116_s27 + $0x80] sm:$0xff]   ;;  %v1541_v31 = vld [vmem:[%s2116_s27 + $0x48] sm:$0xff]   ;;  %v1544_v34 = vld [vmem:[%s2116_s27 + $0x50] sm:$0xff]   ;;  %s2170_s28 = scalar_lea.hbm %s2278_s29, %s1304_s18  ;;  %s1686_s14 = sshll.u32 %s1785_s24, 4  ;;  %s1687_s14 = int_to_ptr.vmem [resolvable:$false] %s1686_s14 }
  0xa3   : > { %1312 = vmatpush3.bf16.msra.mxu0 %v1517_v8  ;;  %1374 = vmatpush3.bf16.msra.mxu1 %v1518_v9  ;;  %v1542_v32 = vld [vmem:[%s2116_s27 + $0x8] sm:$0xff]   ;;  %v1545_v35 = vld [vmem:[%s2116_s27 + $0x10] sm:$0xff]   ;;  %v1547_v37 = vld [vmem:[%s2116_s27 + $0x58] sm:$0xff]   ;;  %p1685_p12 = pneg %p1684_p4  ;;  %s1688_s10 = scalar_lea.vmem %s1687_s14, 512 }
  0xa4   : > { %1313 = vmatprep.subr.bf16.mxu0 %v1519_v10  ;;  %1375 = vmatprep.subr.bf16.mxu1 %v1783_v0  ;;  %v1543_v33 = vld [vmem:[%s2116_s27 + $0x88] sm:$0xff]   ;;  %v1546_v36 = vld [vmem:[%s2116_s27 + $0x90] sm:$0xff]   ;;  %v1548_v38 = vld [vmem:[%s2116_s27 + $0x18] sm:$0xff]   ;;  %p1689_p1 = scmp.lt.s32.totalorder %s2165_s9, %s1687_s14  ;;  %p1690_p5 = scmp.lt.s32.totalorder %s1688_s10, %s1682_s23 }
  0xa5   : > { %v1549_v39 = vld [vmem:[%s2116_s27 + $0x98] sm:$0xff]   ;;  %v1550_v40 = vld [vmem:[%s2116_s27 + $0x60] sm:$0xff]   ;;  %v1553_v43 = vld [vmem:[%s2116_s27 + $0x68] sm:$0xff]  }
  0xa6   : > { %v1551_v41 = vld [vmem:[%s2116_s27 + $0x20] sm:$0xff]   ;;  %v1554_v44 = vld [vmem:[%s2116_s27 + $0x28] sm:$0xff]   ;;  %v1556_v47 = vld [vmem:[%s2116_s27 + $0x70] sm:$0xff]   ;;  %p1691_p3 = por %p1690_p5, %p1689_p1 }
  0xa7   : > { %1314 = vmatpush3.bf16.msra.mxu0 %v1520_v11  ;;  %1376 = vmatpush3.bf16.msra.mxu1 %v1521_v12  ;;  %v1552_v42 = vld [vmem:[%s2116_s27 + $0xa0] sm:$0xff]   ;;  %v1564_v45 = vld [vmem:[#allocation7 + $0x4] ss:$12 sps:$4 sm:$0xff]   ;;  %v1557_v48 = vld [vmem:[%s2116_s27 + $0x30] sm:$0xff]  }
  0xa8   : > { %1315 = vmatprep.subr.bf16.mxu0 %v1522_v13  ;;  %1377 = vmatprep.subr.bf16.mxu1 %v1783_v0  ;;  %v1555_v46 = vld [vmem:[%s2116_s27 + $0xa8] sm:$0xff]   ;;  %v1558_v49 = vld [vmem:[%s2116_s27 + $0xb0] sm:$0xff]   ;;  %v1559_v50 = vld [vmem:[%s2116_s27 + $0x78] sm:$0xff]   ;;  %p1692_p10 = pnand %p1691_p3, %p1685_p12 }
  0xa9   : > { %v1560_v51 = vld [vmem:[%s2116_s27 + $0x38] sm:$0xff]   ;;  %v1562_v53 = vld [vmem:[#allocation7] ss:$12 sps:$4 sm:$0xff]   ;;  %v1301_v9 = vld [vmem:[%s419_s26] ss:$0 sm:$0xff] }
  0xaa   : > { %v1561_v52 = vld [vmem:[%s2116_s27 + $0xb8] sm:$0xff]  }
  0xab   : > { %1316 = vmatpush3.bf16.msra.mxu0 %v1523_v14  ;;  %1378 = vmatpush3.bf16.msra.mxu1 %v1524_v15  ;;  %v1565_v54 = vld [vmem:[#allocation7 + $0x8] ss:$12 sps:$4 sm:$0xff]  }
  0xac   : > { %1317 = vmatprep.subr.bf16.mxu0 %v1525_v16  ;;  %1379 = vmatprep.subr.bf16.mxu1 %v1783_v0 }
  0xaf   : > { %1318 = vmatpush3.bf16.msra.mxu0 %v1526_v17  ;;  %1380 = vmatpush3.bf16.msra.mxu1 %v1527_v18  ;;  %v1302_v17 = vld [vmem:[%s422_s6] ss:$0 sm:$0xff] }
  0xb0   : > { %1319 = vmatprep.subr.bf16.mxu0 %v1528_v19  ;;  %1381 = vmatprep.subr.bf16.mxu1 %v1783_v0 }
  0xb3   : > { %1320 = vmatpush3.bf16.msra.mxu0 %v1529_v20  ;;  %1382 = vmatpush3.bf16.msra.mxu1 %v1530_v21 }
  0xb4   : > { %1321 = vmatprep.subr.bf16.mxu0 %v1531_v22  ;;  %1383 = vmatprep.subr.bf16.mxu1 %v1783_v0 }
  0xb7   : > { %1322 = vmatpush3.bf16.msra.mxu0 %v1532_v24  ;;  %1384 = vmatpush3.bf16.msra.mxu1 %v1533_v25 }
  0xb8   : > { %1338 = vmatprep.subr.bf16.mxu0 %v1537_v27  ;;  %1389 = vmatprep.subr.bf16.mxu1 %v1783_v0 }
  0xba   : > { %680 = vmatmul.mubr.bf16.vlgmr.msra.gmra.mrb[0].mxu0 %v1534_v26  ;;  %1386 = vmatmul.mubr.bf16.vlgmr.msra.gmra.mrb[0].mxu1 %v1538_v28 }
  0xbb   : > { %1339 = vmatpush3.bf16.msra.mxu0 %v1539_v29  ;;  %1390 = vmatpush3.bf16.msra.mxu1 %v1540_v30 }
  0xbc   : > { %1340 = vmatprep.subr.bf16.mxu0 %v1541_v31  ;;  %1391 = vmatprep.subr.bf16.mxu1 %v1783_v0 }
  0xbd   : > { %1405 = vmatprep.mubr.msk.bf16.mxu1 %vm1784_vm0, %v1783_v0  ;;  %979 = vmatprep.mubr.bf16.mxu0 %v1564_v45 }
  0xbf   : > { %1341 = vmatpush3.bf16.msra.mxu0 %v1542_v32  ;;  %1392 = vmatpush3.bf16.msra.mxu1 %v1543_v33 }
  0xc0   : > { %1342 = vmatprep.subr.bf16.mxu0 %v1544_v34  ;;  %1393 = vmatprep.subr.bf16.mxu1 %v1783_v0 }
  0xc3   : > { %1343 = vmatpush3.bf16.msra.mxu0 %v1545_v35  ;;  %1394 = vmatpush3.bf16.msra.mxu1 %v1546_v36 }
  0xc4   : > { %1344 = vmatprep.subr.bf16.mxu0 %v1547_v37  ;;  %1395 = vmatprep.subr.bf16.mxu1 %v1783_v0 }
  0xc7   : > { %1345 = vmatpush3.bf16.msra.mxu0 %v1548_v38  ;;  %1396 = vmatpush3.bf16.msra.mxu1 %v1549_v39 }
  0xc8   : > { %1346 = vmatprep.subr.bf16.mxu0 %v1550_v40  ;;  %1397 = vmatprep.subr.bf16.mxu1 %v1783_v0 }
  0xcb   : > { %1347 = vmatpush3.bf16.msra.mxu0 %v1551_v41  ;;  %1398 = vmatpush3.bf16.msra.mxu1 %v1552_v42 }
  0xcc   : > { %1348 = vmatprep.subr.bf16.mxu0 %v1553_v43  ;;  %1399 = vmatprep.subr.bf16.mxu1 %v1783_v0 }
  0xcf   : > { %1349 = vmatpush3.bf16.msra.mxu0 %v1554_v44  ;;  %1400 = vmatpush3.bf16.msra.mxu1 %v1555_v46 }
  0xd0   : > { %1350 = vmatprep.subr.bf16.mxu0 %v1556_v47  ;;  %1401 = vmatprep.subr.bf16.mxu1 %v1783_v0 }
  0xd3   : > { %1351 = vmatpush3.bf16.msra.mxu0 %v1557_v48  ;;  %1402 = vmatpush3.bf16.msra.mxu1 %v1558_v49 }
  0xd4   : > { %1352 = vmatprep.subr.bf16.mxu0 %v1559_v50  ;;  %1403 = vmatprep.subr.bf16.mxu1 %v1783_v0 }
  0xd7   : > { %1353 = vmatpush3.bf16.msra.mxu0 %v1560_v51  ;;  %1404 = vmatpush3.bf16.msra.mxu1 %v1561_v52 }
  0xda   : > { %980 = vmatmul.mubr.bf16.vlgmr.msra.gmra.mrb[4].mxu0 %v1562_v53  ;;  %1406 = vmatmul.mubr.bf16.vlgmr.msra.gmra.mrb[4].mxu1 %v1565_v54 }
 0x18d   : > { %v1323_v55 = vpop.f32.mrb[0].mxu0  ;;  %v722_v57 = vpop.f32.mrb[0].mxu1 }
 0x18e   : > { %v1324_v56 = vpop.f32.mrb[1].mxu0  ;;  %v1387_v60 = vpop.f32.mrb[1].mxu1 }
 0x18f   : > { %v1325_v58 = vadd.f32 %v1324_v56, %v1323_v55  ;;  %v1326_v59 = vpop.f32.mrb[2].mxu0  ;;  %v725_v62 = vpop.f32.mrb[2].mxu1 }
 0x190   : > { %v1327_v61 = vpop.f32.mrb[3].mxu0  ;;  %v1388_v0 = vpop.f32.mrb[3].mxu1 }
 0x191   : > { %v723_v63 = vadd.f32 %v1325_v58, %v722_v57  ;;  %v1328_v1 = vadd.f32 %v1327_v61, %v1326_v59 }
 0x193   : > { %v726_v2 = vadd.f32 %v1328_v1, %v725_v62 }
 0x1ad   : > { %v1354_v3 = vpop.f32.mrb[4].mxu0  ;;  %v1022_v4 = vpop.f32.mrb[4].mxu1 }
 0x1ae   : > { %v1355_v5 = vpop.f32.mrb[5].mxu0  ;;  %v1407_v7 = vpop.f32.mrb[5].mxu1 }
 0x1af   : > { %v1356_v6 = vadd.f32 %v1355_v5, %v1354_v3  ;;  %v1357_v8 = vpop.f32.mrb[6].mxu0  ;;  %v1025_v10 = vpop.f32.mrb[6].mxu1 }
 0x1b0   : > { %v1358_v11 = vpop.f32.mrb[7].mxu0  ;;  %v1408_v14 = vpop.f32.mrb[7].mxu1 }
 0x1b1   : > { %v1023_v12 = vadd.f32 %v1356_v6, %v1022_v4  ;;  %v1359_v13 = vadd.f32 %v1358_v11, %v1357_v8 }
 0x1b3   : > { %v1047_v15 = vmul.f32 %v1301_v9, %v1023_v12  ;;  %v1026_v16 = vadd.f32 %v1359_v13, %v1025_v10 }
 0x1b5   : > { %v1049_v18 = vadd.f32 %v1047_v15, %v723_v63  ;;  %v1048_v19 = vmul.f32 %v1301_v9, %v1026_v16 }
 0x1b7   : > { %v1058_v20 = vadd.f32 %v1302_v17, %v1049_v18  ;;  %v1050_v21 = vadd.f32 %v1048_v19, %v726_v2 }
 0x1b9   : > { %1060 = vst [vmem:[%s410_s13] sm:$0xff] %v1058_v20  ;;  %v1059_v22 = vadd.f32 %v1302_v17, %v1050_v21 }
 0x1bb   : > { %1061 = vst [vmem:[%s410_s13 + $0x8] sm:$0xff] %v1059_v22 }
 0x1bc   : > { %1695 = shalt.err (!%p1692_p10)
}
 0x1bd   : > { %s1696_s11 = scalar_lea.hbm %s2170_s28, 256  ;;  %s1700_s7 = scalar_lea.hbm %s2278_s29, 512 }
 0x1be   : > { %p1697_p2 = scmp.ne.s32.totalorder %s2170_s28, %s1696_s11  ;;  %p1701_p0 = scmp.lt.u32.totalorder %s2170_s28, %s2278_s29 }
 0x1bf   : > { %p1702_p8 = scmp.lt.u32.totalorder %s1700_s7, %s1696_s11  ;;  %p1704_p13 = scmp.lt.u32.totalorder %s1696_s11, %s2170_s28 }
 0x1c0   : > { %p1698_p7 = pnand %p1697_p2, %p2279_p11 }
 0x1c1   : > { %p1703_p6 = por %p1702_p8, %p1701_p0 }
 0x1c2   : > { %p1699_p9 = pneg %p1698_p7 }
 0x1c3   : > { %p1705_p4 = por %p1704_p13, %p1703_p6 }
 0x1c5   : > { %p1706_p12 = pnand %p1705_p4, %p1699_p9 }
 0x1c7   : > { %1709 = shalt.err (!%p1706_p12)
}
 0x1c8   : > { %s1786_s26 = smov 128   ;;  %s1787_s15 = smov 256  }
 0x1c9   : > { %s1788_s16 = smov 8  }
 0x1ca   : > { %1424 = dma.vmem_to_hbm [thread:$0]  (%p2279_p11), %s2165_s9, 256, %s2170_s28, %s1063_s2, %s1786_s26, %s1787_s15, %s1788_s16  }
 0x1cb PF: > { %s2280_s30 = sld [smem:[#allocation16_spill]]  ;;  %s2281_s6 = sld [smem:[#allocation19_spill]] }
 0x1cc   : > { %s2282_s13 = sld [smem:[#allocation18_spill]] }
 0x1d1   : > { %s1093_s18 = sand.u32 1, %s2280_s30   ;;  %p2283_p1 = scmp.ne.s32.totalorder %s2281_s6, 0 }
 0x1d2   : > { %p2284_p5 = scmp.ge.s32.totalorder %s2282_s13, 2  ;;  %s1094_s20 = scalar_lea.sflag [#allocation6], %s1093_s18 }
 0x1d4   : > { %p1441_p3 = pnand %p2284_p5, %p2283_p1 }
 0x1d6   : > { %1747 = dma.done.wait (!%p1441_p3), %s1094_s20, 256  }
 0x1d7   : > { %1749 = vsyncadd (!%p1441_p3), %s1094_s20, 4294967040  ;;  %s21_s26 = sadd.s32 1, %s2282_s13   ;;  %s2285_s12 = sld [smem:[#allocation17_spill]] }
 0x1d8   : > { %p18_p10 = scmp.ge.s32.totalorder %s21_s26, 4   ;;  %s2286_s23 = sld [smem:[#allocation21_spill]] }
 0x1d9   : > { %s2287_s8 = sld [smem:[#allocation20_spill]]  ;;  %s2288_s21 = smov %s1756_s22 }
 0x1da   : > { %s2290_s24 = smov %s1768_s25  ;;  %20 = sbr.rel (!%p18_p10) target bundleno = 10 (0xa), region = 123 }
 0x1dd   : > { %s2289_s22 = smov %s2285_s12 }
 0x1df   : > { %s2291_s25 = smov %s2287_s8 }
 0x1e1   :  { %1099 = vsyncpa [#allocation5], 1 }
 0x1e2   :  { %1101 = vsyncpa [#allocation5 + $0x1], 1 }
 0x1e3   :  { %1102 = vsyncpa [#allocation8], 1 }
 0x1e4   :  { %1103 = vsyncpa [#allocation6], 1 }
 0x1e5   :  { %1105 = vsyncpa [#allocation6 + $0x1], 1 }

</bundles_post_ra>
